<compile_context>
chip_gen: v7x
topology: tpu7x:2x2x1
jax: 0.10.0
libtpu: 0.0.40
codegen_flags: <defaults>
</compile_context>

<pallas_src>
import jax
import jax.numpy as jnp
from jax.experimental import pallas as pl
from jax.experimental.pallas import tpu as pltpu

BN_EPS = 1e-5


def _se_kernel(x_ref, w1t_ref, b1_ref, w2t_ref, o_ref):
    """x_ref/o_ref: (Nb, C, L); w1t/w2t: (C, C) pre-transposed; b1: (1, C)."""
    length = x_ref.shape[-1]

    # Squeeze: global average pool over L; accumulate in f32 even for bf16 x.
    s = jnp.sum(x_ref[...], axis=-1, dtype=jnp.float32) * (1.0 / length)  # (Nb, C)

    # Excite stage 1: folded Conv1d(1x1, no bias) + BatchNorm, then ReLU.
    h = jnp.dot(s, w1t_ref[...], preferred_element_type=jnp.float32) + b1_ref[...]
    h = jnp.maximum(h, 0.0)

    # Excite stage 2: Conv1d(1x1, no bias) + Sigmoid gate.
    g = jnp.dot(h, w2t_ref[...], preferred_element_type=jnp.float32)
    scale = jax.nn.sigmoid(g).astype(o_ref.dtype)                          # (Nb, C)

    # Re-weight the identity, broadcasting the gate over L (x stays in its dtype).
    o_ref[...] = x_ref[...] * scale[:, :, None]


def _pick_batch_block(n, c, l, itemsize, target_bytes=4 << 20):
    """Batch rows per grid step: ~target_bytes of VMEM per x block, but keep the
    grid length >= 2 when possible so both v7x TensorCores get work."""
    per_row = max(c * l * itemsize, 1)
    nb = max(1, min(n, target_bytes // per_row))
    if n > 1:
        nb = min(nb, pl.cdiv(n, 2))
    return int(nb)


def squeeze_excitation(x, w1, w2, gamma, beta, running_mean, running_var):
    """x: (N, C, L); w1/w2: (C, C) Conv1d weights (C_out, C_in); BN params: (C,)."""
    n, c, l = x.shape

    # Fold BatchNorm1d (inference: running stats) into the first 1x1 conv.
    a = gamma.astype(jnp.float32) * jax.lax.rsqrt(
        running_var.astype(jnp.float32) + BN_EPS)                        # (C,)
    w1_folded = a[:, None] * w1.astype(jnp.float32)                      # scale out rows
    b1 = (beta.astype(jnp.float32)
          - running_mean.astype(jnp.float32) * a).reshape(1, c)          # (1, C)

    # Pre-transpose once (trace time) so the kernel dots contract the last axis.
    w1t = w1_folded.T                                                    # (C_in, C_out)
    w2t = w2.astype(jnp.float32).T

    nb = _pick_batch_block(n, c, l, x.dtype.itemsize)
    grid = (pl.cdiv(n, nb),)

    x_spec = pl.BlockSpec((nb, c, l), lambda i: (i, 0, 0))
    # Constant-index blocks: single-buffer to save VMEM (no double buffering
    # needed since the same tile is reused on every grid step).
    const_cc = pl.BlockSpec((c, c), lambda i: (0, 0), pipeline_mode=pl.Buffered(1))
    const_1c = pl.BlockSpec((1, c), lambda i: (0, 0), pipeline_mode=pl.Buffered(1))

    return pl.pallas_call(
        _se_kernel,
        out_shape=jax.ShapeDtypeStruct((n, c, l), x.dtype),
        grid_spec=pltpu.PrefetchScalarGridSpec(
            num_scalar_prefetch=0,
            grid=grid,
            in_specs=[x_spec, const_cc, const_1c, const_cc],
            out_specs=x_spec,
        ),
        compiler_params=pltpu.CompilerParams(
            dimension_semantics=("parallel",),
            # Raised above the 16/32 MiB default scoped limits (v5e/v6e) while
            # staying safely under v7x's 64 MiB physical VMEM; the ~4 MiB x
            # blocks (double-buffered in+out) plus single-buffered weights use
            # far less than this.
            vmem_limit_bytes=48 << 20,
        ),
    )(x, w1t, b1, w2t)


def _reference(x, w1, w2, gamma, beta, running_mean, running_var):
    xf = x.astype(jnp.float32)
    s = jnp.mean(xf, axis=-1)                                  # (N, C)
    h = s @ w1.T
    h = (h - running_mean) * jax.lax.rsqrt(running_var + BN_EPS) * gamma + beta
    h = jnp.maximum(h, 0.0)
    g = h @ w2.T
    scale = jax.nn.sigmoid(g)
    return (xf * scale[:, :, None]).astype(x.dtype)


if __name__ == "__main__":
    key = jax.random.PRNGKey(0)
    k_x, k_w1, k_w2, k_g, k_b, k_m, k_v = jax.random.split(key, 7)

    N, C, L = 2, 4, 16
    x = jax.random.normal(k_x, (N, C, L), dtype=jnp.float32)

    # Deterministic synthetic parameters (shapes per the module's __init__).
    w1 = jax.random.normal(k_w1, (C, C), dtype=jnp.float32) * 0.5   # Conv1d #1 (C_out, C_in)
    w2 = jax.random.normal(k_w2, (C, C), dtype=jnp.float32) * 0.5   # Conv1d #2
    gamma = 1.0 + 0.1 * jax.random.normal(k_g, (C,), dtype=jnp.float32)
    beta = 0.1 * jax.random.normal(k_b, (C,), dtype=jnp.float32)
    running_mean = 0.1 * jax.random.normal(k_m, (C,), dtype=jnp.float32)
    running_var = 1.0 + 0.1 * jax.random.uniform(k_v, (C,), dtype=jnp.float32)

    out = squeeze_excitation(x, w1, w2, gamma, beta, running_mean, running_var)
    out = jax.block_until_ready(out)

    ref = _reference(x, w1, w2, gamma, beta, running_mean, running_var)
    assert out.shape == (N, C, L)
    assert jnp.allclose(out, ref, atol=1e-5, rtol=1e-5), "mismatch vs reference"

    print("KERNEL_OK")
</pallas_src>

<mosaic_0001>
module attributes {stable_mosaic.version = 11 : i64} {
  func.func @_se_kernel(%arg0: i32, %arg1: memref<1x4x16xf32, #tpu.memory_space<vmem>>, %arg2: memref<4x4xf32, #tpu.memory_space<vmem>>, %arg3: memref<1x4xf32, #tpu.memory_space<vmem>>, %arg4: memref<4x4xf32, #tpu.memory_space<vmem>>, %arg5: memref<1x4x16xf32, #tpu.memory_space<vmem>>) attributes {dimension_semantics = [#tpu.dimension_semantics<parallel>], iteration_bounds = array<i64: 2>, scalar_prefetch = 0 : i64, scratch_operands = 0 : i64, tpu.core_type = #tpu.core_type<tc>, window_params = [{transform_indices = @transform_0, window_bounds = array<i64: 1, 4, 16>}, {pipeline_mode = #tpu.pipeline_mode<synchronous>, transform_indices = @transform_1, window_bounds = array<i64: 4, 4>}, {pipeline_mode = #tpu.pipeline_mode<synchronous>, transform_indices = @transform_2, window_bounds = array<i64: 1, 4>}, {pipeline_mode = #tpu.pipeline_mode<synchronous>, transform_indices = @transform_3, window_bounds = array<i64: 4, 4>}, {transform_indices = @transform_4, window_bounds = array<i64: 1, 4, 16>}]} {
    %c0 = arith.constant 0 : index
    %c0_0 = arith.constant 0 : index
    %c0_1 = arith.constant 0 : index
    %0 = vector.load %arg1[%c0, %c0_0, %c0_1] : memref<1x4x16xf32, #tpu.memory_space<vmem>>, vector<1x4x16xf32>
    %cst = arith.constant dense<0.000000e+00> : vector<1x4xf32>
    %1 = vector.multi_reduction <add>, %0, %cst [2] : vector<1x4x16xf32> to vector<1x4xf32>
    %cst_2 = arith.constant 6.250000e-02 : f32
    %2 = vector.broadcast %cst_2 : f32 to vector<1x4xf32>
    %3 = arith.mulf %1, %2 : vector<1x4xf32>
    %c0_3 = arith.constant 0 : index
    %c0_4 = arith.constant 0 : index
    %4 = vector.load %arg2[%c0_3, %c0_4] : memref<4x4xf32, #tpu.memory_space<vmem>>, vector<4x4xf32>
    %cst_5 = arith.constant dense<0.000000e+00> : vector<1x4xf32>
    %5 = tpu.matmul %3, %4, %cst_5 {dimension_numbers = #tpu.dot_dimension_numbers<[1], [0], [0], [1], [0, 0, 1, 1], [], []>} : vector<1x4xf32>, vector<4x4xf32>, vector<1x4xf32> -> vector<1x4xf32>
    %c0_6 = arith.constant 0 : index
    %c0_7 = arith.constant 0 : index
    %6 = vector.load %arg3[%c0_6, %c0_7] : memref<1x4xf32, #tpu.memory_space<vmem>>, vector<1x4xf32>
    %7 = arith.addf %5, %6 : vector<1x4xf32>
    %cst_8 = arith.constant 0.000000e+00 : f32
    %8 = vector.broadcast %cst_8 : f32 to vector<1x4xf32>
    %9 = arith.maximumf %7, %8 : vector<1x4xf32>
    %c0_9 = arith.constant 0 : index
    %c0_10 = arith.constant 0 : index
    %10 = vector.load %arg4[%c0_9, %c0_10] : memref<4x4xf32, #tpu.memory_space<vmem>>, vector<4x4xf32>
    %cst_11 = arith.constant dense<0.000000e+00> : vector<1x4xf32>
    %11 = tpu.matmul %9, %10, %cst_11 {dimension_numbers = #tpu.dot_dimension_numbers<[1], [0], [0], [1], [0, 0, 1, 1], [], []>} : vector<1x4xf32>, vector<4x4xf32>, vector<1x4xf32> -> vector<1x4xf32>
    %12 = arith.negf %11 : vector<1x4xf32>
    %13 = math.exp %12 : vector<1x4xf32>
    %cst_12 = arith.constant 1.000000e+00 : f32
    %14 = vector.broadcast %cst_12 : f32 to vector<1x4xf32>
    %15 = arith.addf %14, %13 : vector<1x4xf32>
    %16 = arith.divf %14, %15 : vector<1x4xf32>
    %c0_13 = arith.constant 0 : index
    %c0_14 = arith.constant 0 : index
    %c0_15 = arith.constant 0 : index
    %17 = vector.load %arg1[%c0_13, %c0_14, %c0_15] : memref<1x4x16xf32, #tpu.memory_space<vmem>>, vector<1x4x16xf32>
    %18 = vector.shape_cast %16 : vector<1x4xf32> to vector<1x4x1xf32>
    %19 = vector.broadcast %18 : vector<1x4x1xf32> to vector<1x4x16xf32>
    %20 = arith.mulf %17, %19 : vector<1x4x16xf32>
    %c0_16 = arith.constant 0 : index
    %c0_17 = arith.constant 0 : index
    %c0_18 = arith.constant 0 : index
    %21 = vector.load %arg5[%c0_16, %c0_17, %c0_18] : memref<1x4x16xf32, #tpu.memory_space<vmem>>, vector<1x4x16xf32>
    tpu.vector_store %arg5[%c0_16, %c0_17, %c0_18], %20 {strides = array<i32>} : memref<1x4x16xf32, #tpu.memory_space<vmem>>, vector<1x4x16xf32>,
    return
  }
  func.func @transform_0(%arg0: i32) -> (i32, i32, i32) {
    %c0_i32 = arith.constant 0 : i32
    %c0_i32_0 = arith.constant 0 : i32
    %c0_i32_1 = arith.constant 0 : i32
    return %arg0, %c0_i32, %c0_i32_0 : i32, i32, i32
  }
  func.func @transform_1(%arg0: i32) -> (i32, i32) {
    %c0_i32 = arith.constant 0 : i32
    %c0_i32_0 = arith.constant 0 : i32
    %c0_i32_1 = arith.constant 0 : i32
    return %c0_i32, %c0_i32_0 : i32, i32
  }
  func.func @transform_2(%arg0: i32) -> (i32, i32) {
    %c0_i32 = arith.constant 0 : i32
    %c0_i32_0 = arith.constant 0 : i32
    %c0_i32_1 = arith.constant 0 : i32
    return %c0_i32, %c0_i32_0 : i32, i32
  }
  func.func @transform_3(%arg0: i32) -> (i32, i32) {
    %c0_i32 = arith.constant 0 : i32
    %c0_i32_0 = arith.constant 0 : i32
    %c0_i32_1 = arith.constant 0 : i32
    return %c0_i32, %c0_i32_0 : i32, i32
  }
  func.func @transform_4(%arg0: i32) -> (i32, i32, i32) {
    %c0_i32 = arith.constant 0 : i32
    %c0_i32_0 = arith.constant 0 : i32
    %c0_i32_1 = arith.constant 0 : i32
    return %arg0, %c0_i32, %c0_i32_0 : i32, i32, i32
  }
}

</mosaic_0001>

<bundles_post_ra>
// kernel: tpu_custom_call.1
= control target key start
LH: loop header
LB: loop body
LE: loop exit
PB: predicated region body
PF: predicated region fallthrough
CT: control target
= control target key end

     0   :  { %9 = vsyncpa [#allocation3], 0  ;;  %s976_s0 = inlined_call_operand.hbm [shape: f32[2,4,16], index: 0, kind: input, shape index: {}]   ;;  %s977_s1 = inlined_call_operand.hbm [shape: f32[4,4], index: 1, kind: input, shape index: {}]   ;;  %s978_s2 = inlined_call_operand.vmem [shape: f32[1,4], index: 2, kind: input, shape index: {}]   ;;  %s979_s3 = inlined_call_operand.vmem [shape: f32[4,4], index: 3, kind: input, shape index: {}]   ;;  %s980_s4 = inlined_call_operand.hbm [shape: f32[2,4,16], index: 4, kind: output, shape index: {}]  }
   0x1   :  { %11 = vsyncpa [#allocation3 + $0x1], 0 }
   0x2   :  { %12 = vsyncpa [#allocation6], 0 }
   0x3   :  { %13 = vsyncpa [#allocation4], 0 }
   0x4   :  { %15 = vsyncpa [#allocation4 + $0x1], 0  ;;  %s761_s15 = smov 0   ;;  %s763_s16 = smov 0  }
   0x5   :  { %s765_s17 = smov 0   ;;  %s767_s18 = smov 0  }
   0x6 LB: > { %s782_s19 = sadd.s32 4294967295, %s729_s18   ;;  %s505_s20 = sadd.s32 4294967294, %s729_s18   ;;  %s729_s18 = sphi %s767_s18, %s1004_s18   ;;  %s725_s17 = sphi %s765_s17, %s1003_s17   ;;  %s721_s16 = sphi %s763_s16, %s1002_s16   ;;  %s717_s15 = sphi %s761_s15, %s1001_s15  }
   0x7   : > { %p41_p0 = scmp.ne.s32.totalorder %s721_s16, %s717_s15  ;;  %p981_p1 = scmp.eq.s32.totalorder %s782_s19, 0 }
   0x8   : > { %p134_p3 = scmp.eq.s32.totalorder %s505_s20, 1  ;;  %p506_p5 = scmp.ge.s32.totalorder %s729_s18, 1 }
   0x9   : > { %p791_p4 = por %p981_p1, %p41_p0  ;;  %p141_p7 = scmp.lt.s32.totalorder %s729_s18, 3 }
   0xa   : > { %p796_p6 = por %p134_p3, %p41_p0  ;;  %s731_s24 = smov [#allocation5]  }
   0xb   : > { %s984_s21 = scalar_select %p791_p4, 1, 0 }
   0xc   : > { %s985_s22 = scalar_select %p796_p6, 1, 0 }
   0xd   : > { %p801_p8 = pnand %p506_p5, %p141_p7  ;;  %s154_s25 = sshll.u32 %s731_s24, 4  ;;  %s155_s25 = int_to_ptr.vmem [resolvable:$true] %s154_s25 }
   0xe   : > { %s809_s26 = sadd.s32 1, %s729_s18   ;;  %s28_s30 = sadd.s32 1, %s725_s17 }
   0xf   : > { %s986_s23 = scalar_select %p801_p8, 1, 0 }
  0x10   : > { %p546_p10 = pneg %p801_p8  ;;  %s25_s28 = ssub.s32 %s729_s18, %s809_s26 }
  0x11   : > { %p819_p12 = scmp.eq.s32.totalorder %s25_s28, 0  ;;  %s601_s7 = scalar_lea.hbm %s977_s1, 64 }
  0x12   : > { %p813_p11 = pnand %p546_p10, %p981_p1  ;;  %p602_p0 = scmp.ne.s32.totalorder %s977_s1, %s601_s7 }
  0x13   : > { %s988_s29 = scalar_select %p819_p12, 1, 0 }
  0x14   : > { %p603_p3 = pneg %p813_p11  ;;  %p608_p10 = scmp.lt.u32.totalorder %s601_s7, %s977_s1 }
  0x16   : > { %p604_p5 = pnand %p603_p3, %p602_p0 }
  0x18   : > { %p605_p7 = pneg %p604_p5 }
  0x1a   : > { %p610_p9 = pnand %p608_p10, %p605_p7 }
  0x1c   : > { %613 = shalt.err (!%p610_p9)
}
  0x1d   : > { %s614_s12 = scalar_lea.vmem %s155_s25, 64  ;;  %p622_p6 = scmp.lt.s32.totalorder %s155_s25, %s155_s25 }
  0x1e   : > { %p615_p1 = scmp.ne.s32.totalorder %s155_s25, %s614_s12  ;;  %p623_p4 = scmp.lt.s32.totalorder %s614_s12, %s614_s12 }
  0x20   : > { %p617_p2 = pnand %p615_p1, %p603_p3  ;;  %p624_p8 = por %p623_p4, %p622_p6 }
  0x22   : > { %p618_p13 = pneg %p617_p2 }
  0x24   : > { %p625_p12 = pnand %p624_p8, %p618_p13 }
  0x26   : > { %628 = shalt.err (!%p625_p12)
}
  0x27   : > { %549 = dma.hbm_to_vmem [thread:$0]  (!%p813_p11), %s977_s1, 64, %s155_s25, [#allocation6]  }
  0x28   : > { %p989_p1 = scmp.ne.s32.totalorder %s988_s29, 0  ;;  %p36_p2 = scmp.eq.s32.totalorder %s729_s18, 0 }
  0x29   : > { %p990_p4 = scmp.ne.s32.totalorder %s725_s17, %s721_s16  ;;  %p991_p6 = scmp.eq.s32.totalorder %s782_s19, 1 }
  0x2a   : > { %s845_s20 = scalar_select %p989_p1, %s725_s17, %s28_s30  }
  0x2b   : > { %p853_p8 = por %p991_p6, %p990_p4  ;;  %p559_p9 = scmp.lt.s32.totalorder %s729_s18, 2 }
  0x2c   : > { %s171_s27 = sand.u32 1, %s725_s17   ;;  %p993_p12 = pmov %p990_p4 }
  0x2d   : > { %s509_s28 = sshll.u32 %s171_s27, 2  ;;  %s510_s5 = sshll.u32 %s729_s18, 6 }
  0x2e   : > { %p37_p13 = por %p36_p2, %p993_p12  ;;  %s866_s25 = scalar_lea.hbm %s976_s0, %s510_s5 }
  0x2f   : > { %s175_s29 = scalar_lea.vmem [#allocation2], %s509_s28  ;;  %s172_s9 = scalar_lea.sflag [#allocation3], %s171_s27 }
  0x30   : > { %s182_s30 = sshll.u32 %s175_s29, 4  ;;  %p868_p11 = pnand %p559_p9, %p37_p13  ;;  %s872_s30 = int_to_ptr.vmem [resolvable:$true] %s182_s30 }
  0x31   : > { %s629_s10 = scalar_lea.hbm %s866_s25, 64  ;;  %s634_s13 = scalar_lea.hbm %s976_s0, 128 }
  0x32   : > { %p630_p0 = scmp.ne.s32.totalorder %s866_s25, %s629_s10  ;;  %p631_p3 = pneg %p868_p11 }
  0x33   : > { %p635_p10 = scmp.lt.u32.totalorder %s866_s25, %s976_s0  ;;  %p636_p1 = scmp.lt.u32.totalorder %s634_s13, %s629_s10 }
  0x34   : > { %p632_p5 = pnand %p631_p3, %p630_p0  ;;  %p638_p4 = scmp.lt.u32.totalorder %s629_s10, %s866_s25 }
  0x35   : > { %p637_p2 = por %p636_p1, %p635_p10 }
  0x36   : > { %p633_p7 = pneg %p632_p5 }
  0x37   : > { %p639_p6 = por %p638_p4, %p637_p2 }
  0x39   : > { %p640_p9 = pnand %p639_p6, %p633_p7 }
  0x3b   : > { %643 = shalt.err (!%p640_p9)
}
  0x3c   : > { %s644_s27 = scalar_lea.vmem %s872_s30, 64  ;;  %s732_s5 = smov [#allocation2]  }
  0x3d   : > { %p645_p12 = scmp.ne.s32.totalorder %s872_s30, %s644_s27  ;;  %s649_s6 = sshll.u32 %s732_s5, 4  ;;  %s650_s6 = int_to_ptr.vmem [resolvable:$false] %s649_s6 }
  0x3e   : > { %s651_s7 = scalar_lea.vmem %s650_s6, 128  ;;  %p652_p5 = scmp.lt.s32.totalorder %s872_s30, %s650_s6 }
  0x3f   : > { %p647_p13 = pnand %p645_p12, %p631_p3  ;;  %p653_p10 = scmp.lt.s32.totalorder %s651_s7, %s644_s27 }
  0x41   : > { %p648_p0 = pneg %p647_p13  ;;  %p654_p1 = por %p653_p10, %p652_p5 }
  0x43   : > { %p655_p2 = pnand %p654_p1, %p648_p0 }
  0x45   : > { %658 = shalt.err (!%p655_p2)
}
  0x46   : > { %553 = dma.hbm_to_vmem [thread:$0]  (!%p868_p11), %s866_s25, 64, %s872_s30, %s172_s9  }
  0x47   : > { %p995_p7 = scmp.ne.s32.totalorder %s986_s23, 0 }
  0x48   : > { %s902_s29 = sand.u32 (!%p995_p7), 1, %s721_s16   ;;  %p996_p3 = scmp.ne.s32.totalorder (!%p995_p7), %s984_s21, 0 }
  0x49   : > { %191 = sbr.rel (%p995_p7) target bundleno = 819 (0x333), region = 36  ;;  %s512_s10 = sshll.u32 (!%p995_p7), %s902_s29, 2 }
  0x4a   : > { %s194_s11 = scalar_lea.sflag (!%p995_p7), [#allocation3], %s902_s29  ;;  %s197_s12 = scalar_lea.vmem (!%p995_p7), [#allocation2], %s512_s10 }
  0x50   : > { %704 = dma.done.wait (%p996_p3), %s194_s11, 64  }
  0x51   : > { %706 = vsyncadd (%p996_p3), %s194_s11, 4294967232  ;;  %p997_p11 = scmp.eq.s32.totalorder %s782_s19, 0 }
  0x53   : > { %708 = dma.done.wait (%p997_p11), [#allocation6], 64   ;;  %p998_p4 = pmov %p997_p11 }
  0x54   : > { %vm227_vm0 = vcmask 125952   ;;  %v226_v0 = vld [vmem:[%s197_s12] sm:$0xf]  ;;  %v733_v2 = vmov 0.0   ;;  %v232_v3 = vld [vmem:[#allocation5] sm:$0xf]  ;;  %v235_v4 = vlaneseq }
  0x55   : > { %710 = vsyncadd (%p998_p4), [#allocation6], 4294967232  ;;  %v228_v1 = vsel %vm227_vm0, %v226_v0, 0.0  ;;  %528 = vmatprep.subr.mxu0 %v733_v2  ;;  %vm244_vm1 = vcmask 1043456   ;;  %533 = vmatprep.subr.mxu1 %v733_v2  ;;  %vm734_vm2 = vmmov 0   ;;  %vm241_vm3 = vcmask 31744  }
  0x56   : > { %229 = vadd.xlane.f32.xlu0 %v228_v1  ;;  %529 = vmatpush3.msk.msra.mxu0 %vm244_vm1, %v232_v3  ;;  %v236_v5 = vand.u32 127, %v235_v4  ;;  %v238_v6 = vshrl.u32 %v235_v4, 7  ;;  %v319_v11 = vld [vmem:[%s979_s3] sm:$0xf]  ;;  %s521_s8 = sshll.u32 %s782_s19, 6  ;;  %s225_s9 = scalar_lea.vmem [#allocation7], %s512_s10 }
  0x57   : > { %530 = vmatprep.mubr.msk.f32.mxu0 %vm734_vm2, %v733_v2  ;;  %535 = vmatprep.mubr.msk.f32.mxu1 %vm734_vm2, %v733_v2  ;;  %v233_v12 = vld [vmem:[%s978_s2] sm:$0x1]  ;;  %s425_s13 = sshll.u32 %s225_s9, 4  ;;  %s931_s27 = scalar_lea.hbm %s980_s4, %s521_s8  ;;  %s933_s13 = int_to_ptr.vmem [resolvable:$true] %s425_s13 }
  0x58   : > { %v239_v7 = vsub.s32 %v236_v5, %v238_v6  ;;  %534 = vmatpush3.msk.msra.mxu1 %vm244_vm1, %v319_v11  ;;  %v404_v22 = vsub.s32 0, %v238_v6  ;;  %s412_s5 = scalar_lea.sflag [#allocation4], %s902_s29  ;;  %s659_s6 = scalar_lea.vmem %s933_s13, 64 }
  0x59   : > { %p660_p6 = scmp.ne.s32.totalorder %s933_s13, %s659_s6  ;;  %s735_s19 = smov [#allocation7]  }
  0x5a   : > { %s663_s7 = sshll.u32 %s735_s19, 4  ;;  %s664_s7 = int_to_ptr.vmem [resolvable:$false] %s663_s7 }
  0x5b   : > { %p661_p9 = pnand %p660_p6, %p853_p8  ;;  %s665_s10 = scalar_lea.vmem %s664_s7, 128 }
  0x5c   : > { %p666_p13 = scmp.lt.s32.totalorder %s933_s13, %s664_s7  ;;  %p667_p0 = scmp.lt.s32.totalorder %s665_s10, %s659_s6 }
  0x5d   : > { %p662_p12 = pneg %p661_p9 }
  0x5e   : > { %p668_p5 = por %p667_p0, %p666_p13 }
  0x60   : > { %p669_p10 = pnand %p668_p5, %p662_p12 }
  0xe3   : > { %v230_v8 = vpop.xlane.xlu0 %229 }
  0xe4   : > { %v231_v9 = vmul.f32 0.0625, %v230_v8 }
  0xe6   : > { %v240_v10 = vrot.slane %v231_v9, %v239_v7 }
  0xe8   : > { %531 = vmatmul.mubr.msk.f32.vlgmr.msra.gmra.mrb[0].mxu0 %vm241_vm3, %v240_v10 }
 0x1bb   : > { %v314_v13 = vpop.f32.mrb[0].mxu0 }
 0x1bc   : > { %v315_v14 = vadd.f32 %v314_v13, %v233_v12  ;;  %v532_v15 = vpop.f32.mrb[1].mxu0 }
 0x1be   : > { %v318_v16 = vmax.f32 %v315_v14, 0.0 }
 0x1c0   : > { %536 = vmatmul.mubr.msk.f32.vlgmr.msra.gmra.mrb[0].mxu1 %vm241_vm3, %v318_v16 }
 0x293   : > { %v392_v17 = vpop.f32.mrb[0].mxu1 }
 0x294   : > { %v519_v18 = vmul.f32 -1.442695, %v392_v17  ;;  %v537_v19 = vpop.f32.mrb[1].mxu1 }
 0x296   : > { %597 = vpow2.f32 %v519_v18 }
 0x2a0   : > { %v598_v20 = vpop.eup %597 }
 0x2a1   : > { %v399_v21 = vadd.f32 1.0, %v598_v20 }
 0x2a3   : > { %599 = vrcp.f32 %v399_v21 }
 0x2ad   : > { %v600_v23 = vpop.eup %599 }
 0x2ae   : > { %v405_v24 = vrot.slane %v600_v23, %v404_v22 }
 0x2b0   : > { %407 = vbcast.lane.b32.xlu0 %v405_v24, 256 }
 0x322   : > { %v408_v25 = vpop.permute.xlu0 %407 }
 0x323   : > { %v409_v26 = vmul.f32 %v408_v25, %v226_v0 }
 0x325   : > { %410 = vst.msk [vmem:[%s225_s9] sm:$0xf] %vm227_vm0, %v409_v26 }
 0x326   : > { %672 = shalt.err (!%p669_p10)
}
 0x327   : > { %s673_s29 = scalar_lea.hbm %s931_s27, 64  ;;  %s677_s21 = scalar_lea.hbm %s980_s4, 128 }
 0x328   : > { %p674_p1 = scmp.ne.s32.totalorder %s931_s27, %s673_s29  ;;  %p678_p3 = scmp.lt.u32.totalorder %s931_s27, %s980_s4 }
 0x329   : > { %p679_p11 = scmp.lt.u32.totalorder %s677_s21, %s673_s29  ;;  %p681_p6 = scmp.lt.u32.totalorder %s673_s29, %s931_s27 }
 0x32a   : > { %p675_p2 = pnand %p674_p1, %p853_p8 }
 0x32b   : > { %p680_p4 = por %p679_p11, %p678_p3 }
 0x32c   : > { %p676_p7 = pneg %p675_p2 }
 0x32d   : > { %p682_p9 = por %p681_p6, %p680_p4 }
 0x32f   : > { %p683_p12 = pnand %p682_p9, %p676_p7 }
 0x331   : > { %686 = shalt.err (!%p683_p12)
}
 0x332   : > { %544 = dma.vmem_to_hbm [thread:$0]  (%p853_p8), %s933_s13, 64, %s931_s27, %s412_s5  }
 0x333 PF: > { %s437_s30 = sand.u32 1, %s717_s15   ;;  %p999_p13 = scmp.ne.s32.totalorder %s985_s22, 0 }
 0x334   : > { %p1000_p0 = scmp.ge.s32.totalorder %s729_s18, 2  ;;  %s438_s8 = scalar_lea.sflag [#allocation4], %s437_s30 }
 0x336   : > { %p555_p5 = pnand %p1000_p0, %p999_p13 }
 0x338   : > { %712 = dma.done.wait (!%p555_p5), %s438_s8, 64  }
 0x339   : > { %714 = vsyncadd (!%p555_p5), %s438_s8, 4294967232  ;;  %p18_p10 = scmp.ge.s32.totalorder %s809_s26, 4   ;;  %s1001_s15 = smov %s721_s16 }
 0x33a   : > { %s1002_s16 = smov %s725_s17  ;;  %s1003_s17 = smov %s845_s20 }
 0x33b   : > { %s1004_s18 = smov %s809_s26  ;;  %20 = sbr.rel (!%p18_p10) target bundleno = 6 (0x6), region = 85 }
 0x342   :  { %443 = vsyncpa [#allocation3], 1 }
 0x343   :  { %445 = vsyncpa [#allocation3 + $0x1], 1 }
 0x344   :  { %446 = vsyncpa [#allocation6], 1 }
 0x345   :  { %447 = vsyncpa [#allocation4], 1 }
 0x346   :  { %449 = vsyncpa [#allocation4 + $0x1], 1 }

</bundles_post_ra>
